<compile_context>
chip_gen: v7x
topology: tpu7x:2x2x1
jax: 0.10.0
libtpu: 0.0.40
codegen_flags: <defaults>
</compile_context>

<pallas_src>
import dataclasses

import jax
import jax.numpy as jnp
from jax.experimental import pallas as pl
from jax.experimental.pallas import tpu as pltpu


@dataclasses.dataclass
class IrtModelOutput:
    logits: jax.Array
    difficulty: jax.Array
    skill: jax.Array


def _round_up(x: int, m: int) -> int:
    return (x + m - 1) // m * m


def _irt_fused_kernel(x_ref, w_ref, bias_ref, out_ref):
    # One wide MXU matmul producing the packed [skill | difficulty | logit | pad]
    # slab for this batch tile; f32 accumulation + f32 bias epilogue, lane-dense store.
    acc = jnp.dot(x_ref[...], w_ref[...], preferred_element_type=jnp.float32)
    out_ref[...] = acc + bias_ref[...]


def irt_forward(agent_inputs, item_inputs, params, *, tile_b=1024):
    """Fused IRT forward pass in a single batch-tiled Pallas kernel."""
    B, d_agent = agent_inputs.shape
    _, d_item = item_inputs.shape
    n_dim = params["w_a"].shape[1]

    # ---- pack weights: block-diagonal [skill | difficulty] + fused logit column ----
    n_pad = _round_up(2 * n_dim + 1, 128)  # lane-dense, 128-aligned output slab

    w_a = params["w_a"].astype(jnp.float32)
    w_d = params["w_d"].astype(jnp.float32)
    b_a = params["b_a"].reshape(-1).astype(jnp.float32)
    b_d = params["b_d"].reshape(-1).astype(jnp.float32)
    guess = params["guess_bias"].reshape(-1)[0].astype(jnp.float32)

    w_packed = jnp.zeros((d_agent + d_item, n_pad), jnp.float32)
    w_packed = w_packed.at[:d_agent, :n_dim].set(w_a)
    w_packed = w_packed.at[d_agent:, n_dim:2 * n_dim].set(w_d)
    # extra lane: logits = sum(skill - difficulty) comes out of the same matmul
    w_packed = w_packed.at[:d_agent, 2 * n_dim].set(w_a.sum(axis=1))
    w_packed = w_packed.at[d_agent:, 2 * n_dim].set(-w_d.sum(axis=1))

    bias_row = jnp.zeros((1, n_pad), jnp.float32)
    bias_row = bias_row.at[0, :n_dim].set(b_a)
    bias_row = bias_row.at[0, n_dim:2 * n_dim].set(b_d)
    bias_row = bias_row.at[0, 2 * n_dim].set(b_a.sum() - b_d.sum() + guess)

    # ---- concat inputs along features, pad batch to the tile size ----
    x = jnp.concatenate([agent_inputs, item_inputs], axis=-1).astype(jnp.float32)
    tb = _round_up(min(int(tile_b), _round_up(B, 8)), 8)   # multiple of 8, VMEM-safe
    b_pad = _round_up(B, tb)
    if b_pad != B:
        x = jnp.pad(x, ((0, b_pad - B), (0, 0)))

    # bf16 matmul operands (half the HBM traffic on this mem-bound kernel);
    # the kernel accumulates in f32 and keeps the bias epilogue in f32.
    x_bf = x.astype(jnp.bfloat16)
    w_bf = w_packed.astype(jnp.bfloat16)

    k = d_agent + d_item
    grid = (b_pad // tb,)

    slab = pl.pallas_call(
        _irt_fused_kernel,
        out_shape=jax.ShapeDtypeStruct((b_pad, n_pad), jnp.float32),
        grid=grid,
        in_specs=[
            pl.BlockSpec((tb, k), lambda i: (i, 0)),      # batch tile of packed inputs
            pl.BlockSpec((k, n_pad), lambda i: (0, 0)),   # packed weights (pinned)
            pl.BlockSpec((1, n_pad), lambda i: (0, 0)),   # fused bias row (pinned)
        ],
        out_specs=pl.BlockSpec((tb, n_pad), lambda i: (i, 0)),
        compiler_params=pltpu.CompilerParams(
            dimension_semantics=("parallel",),            # megacore sharding on v7x
        ),
    )(x_bf, w_bf, bias_row)

    slab = slab[:B]
    skill = slab[:, :n_dim]
    difficulty = slab[:, n_dim:2 * n_dim]
    logits = slab[:, 2 * n_dim]

    # TODO(synk): agent_type_inputs embeddings (fit_agent_type_embeddings) and the
    # optional characteristics Bounder are config-gated and not defined in the
    # abstract base; omitted here.
    return IrtModelOutput(logits=logits, difficulty=difficulty, skill=skill)


def init_params(key, d_agent, d_item, n_dim):
    k1, k2, k3, k4 = jax.random.split(key, 4)
    return {
        # agent layers (compute_agent_skills): Linear(d_agent -> n_dim)
        "w_a": jax.random.normal(k1, (d_agent, n_dim), jnp.float32) * 0.1,
        "b_a": jax.random.normal(k3, (1, n_dim), jnp.float32) * 0.1,
        # item layers (compute_item_characteristics): Linear(d_item -> n_dim)
        "w_d": jax.random.normal(k2, (d_item, n_dim), jnp.float32) * 0.1,
        "b_d": jax.random.normal(k4, (1, n_dim), jnp.float32) * 0.1,
        # nn.Parameter(torch.zeros(1)) -- guess_bias (fit_guess_bias irrelevant for fwd)
        "guess_bias": jnp.full((1,), 0.05, jnp.float32),
    }


if __name__ == "__main__":
    B, D_AGENT, D_ITEM, N_DIM = 8, 32, 32, 16

    key = jax.random.PRNGKey(0)
    k_params, k_agent, k_item = jax.random.split(key, 3)

    params = init_params(k_params, D_AGENT, D_ITEM, N_DIM)
    agent_inputs = jax.random.normal(k_agent, (B, D_AGENT), jnp.float32)
    item_inputs = jax.random.normal(k_item, (B, D_ITEM), jnp.float32)

    out = irt_forward(agent_inputs, item_inputs, params)
    jax.block_until_ready((out.logits, out.difficulty, out.skill))

    assert out.skill.shape == (B, N_DIM)
    assert out.difficulty.shape == (B, N_DIM)
    assert out.logits.shape == (B,)

    # Module-semantics f32 reference (loose tolerance: matmul operands are bf16).
    skill_f32 = agent_inputs @ params["w_a"] + params["b_a"]
    diff_f32 = item_inputs @ params["w_d"] + params["b_d"]
    logits_f32 = (skill_f32 - diff_f32).sum(-1) + params["guess_bias"][0]
    assert jnp.allclose(out.skill, skill_f32, atol=5e-2), "skill mismatch"
    assert jnp.allclose(out.difficulty, diff_f32, atol=5e-2), "difficulty mismatch"
    assert jnp.allclose(out.logits, logits_f32, atol=1e-1), "logits mismatch"

    # Tight check against a bf16-operand reference (same rounding as the kernel).
    a_bf = agent_inputs.astype(jnp.bfloat16).astype(jnp.float32)
    i_bf = item_inputs.astype(jnp.bfloat16).astype(jnp.float32)
    wa_bf = params["w_a"].astype(jnp.bfloat16).astype(jnp.float32)
    wd_bf = params["w_d"].astype(jnp.bfloat16).astype(jnp.float32)
    assert jnp.allclose(out.skill, a_bf @ wa_bf + params["b_a"], atol=1e-3)
    assert jnp.allclose(out.difficulty, i_bf @ wd_bf + params["b_d"], atol=1e-3)

    print("KERNEL_OK")
</pallas_src>

<mosaic_0001>
module attributes {stable_mosaic.version = 11 : i64} {
  func.func @_irt_fused_kernel(%arg0: i32, %arg1: memref<8x64xbf16, #tpu.memory_space<vmem>>, %arg2: memref<64x128xbf16, #tpu.memory_space<vmem>>, %arg3: memref<1x128xf32, #tpu.memory_space<vmem>>, %arg4: memref<8x128xf32, #tpu.memory_space<vmem>>) attributes {dimension_semantics = [#tpu.dimension_semantics<parallel>], iteration_bounds = array<i64: 1>, scalar_prefetch = 0 : i64, scratch_operands = 0 : i64, tpu.core_type = #tpu.core_type<tc>, window_params = [{transform_indices = @transform_0, window_bounds = array<i64: 8, 64>}, {pipeline_mode = #tpu.pipeline_mode<synchronous>, transform_indices = @transform_1, window_bounds = array<i64: 64, 128>}, {pipeline_mode = #tpu.pipeline_mode<synchronous>, transform_indices = @transform_2, window_bounds = array<i64: 1, 128>}, {transform_indices = @transform_3, window_bounds = array<i64: 8, 128>}]} {
    %c0 = arith.constant 0 : index
    %c0_0 = arith.constant 0 : index
    %0 = vector.load %arg1[%c0, %c0_0] : memref<8x64xbf16, #tpu.memory_space<vmem>>, vector<8x64xbf16>
    %c0_1 = arith.constant 0 : index
    %c0_2 = arith.constant 0 : index
    %1 = vector.load %arg2[%c0_1, %c0_2] : memref<64x128xbf16, #tpu.memory_space<vmem>>, vector<64x128xbf16>
    %cst = arith.constant dense<0.000000e+00> : vector<8x128xf32>
    %2 = tpu.matmul %0, %1, %cst {dimension_numbers = #tpu.dot_dimension_numbers<[1], [0], [0], [1], [0, 0, 1, 1], [], []>} : vector<8x64xbf16>, vector<64x128xbf16>, vector<8x128xf32> -> vector<8x128xf32>
    %c0_3 = arith.constant 0 : index
    %c0_4 = arith.constant 0 : index
    %3 = vector.load %arg3[%c0_3, %c0_4] : memref<1x128xf32, #tpu.memory_space<vmem>>, vector<1x128xf32>
    %4 = vector.broadcast %3 : vector<1x128xf32> to vector<8x128xf32>
    %5 = arith.addf %2, %4 : vector<8x128xf32>
    %c0_5 = arith.constant 0 : index
    %c0_6 = arith.constant 0 : index
    %6 = vector.load %arg4[%c0_5, %c0_6] : memref<8x128xf32, #tpu.memory_space<vmem>>, vector<8x128xf32>
    tpu.vector_store %arg4[%c0_5, %c0_6], %5 {strides = array<i32>} : memref<8x128xf32, #tpu.memory_space<vmem>>, vector<8x128xf32>,
    return
  }
  func.func @transform_0(%arg0: i32) -> (i32, i32) {
    %c0_i32 = arith.constant 0 : i32
    %c0_i32_0 = arith.constant 0 : i32
    return %arg0, %c0_i32 : i32, i32
  }
  func.func @transform_1(%arg0: i32) -> (i32, i32) {
    %c0_i32 = arith.constant 0 : i32
    %c0_i32_0 = arith.constant 0 : i32
    %c0_i32_1 = arith.constant 0 : i32
    return %c0_i32, %c0_i32_0 : i32, i32
  }
  func.func @transform_2(%arg0: i32) -> (i32, i32) {
    %c0_i32 = arith.constant 0 : i32
    %c0_i32_0 = arith.constant 0 : i32
    %c0_i32_1 = arith.constant 0 : i32
    return %c0_i32, %c0_i32_0 : i32, i32
  }
  func.func @transform_3(%arg0: i32) -> (i32, i32) {
    %c0_i32 = arith.constant 0 : i32
    %c0_i32_0 = arith.constant 0 : i32
    return %arg0, %c0_i32 : i32, i32
  }
}

</mosaic_0001>

<bundles_post_ra>
// kernel: tpu_custom_call.1
= control target key start
LH: loop header
LB: loop body
LE: loop exit
PB: predicated region body
PF: predicated region fallthrough
CT: control target
= control target key end

     0   :  { %8 = vsyncpa [#allocation3], 0  ;;  %s322_s0 = inlined_call_operand.hbm [shape: bf16[8,64], index: 0, kind: input, shape index: {}]   ;;  %s323_s1 = inlined_call_operand.hbm [shape: bf16[64,128], index: 1, kind: input, shape index: {}]   ;;  %s324_s2 = inlined_call_operand.vmem [shape: f32[1,128], index: 2, kind: input, shape index: {}]   ;;  %s325_s3 = inlined_call_operand.hbm [shape: f32[8,128], index: 3, kind: output, shape index: {}]  }
   0x1   :  { %9 = vsyncpa [#allocation6], 0 }
   0x2   :  { %10 = vsyncpa [#allocation4], 0  ;;  %s249_s12 = smov [#allocation2]   ;;  %s250_s14 = smov [#allocation5]  }
   0x3   :  { %s17_s13 = sshll.u32 %s249_s12, 4  ;;  %s26_s15 = sshll.u32 %s250_s14, 4  ;;  %s18_s13 = int_to_ptr.vmem [resolvable:$true] %s17_s13  ;;  %s276_s15 = int_to_ptr.vmem [resolvable:$true] %s26_s15 }
   0x4   :  { %s177_s18 = scalar_lea.hbm %s322_s0, 64 }
   0x5   :  { %p178_p0 = scmp.ne.s32.totalorder %s322_s0, %s177_s18  ;;  %p181_p1 = scmp.lt.u32.totalorder %s177_s18, %s322_s0 }
   0x7   :  { %p183_p2 = pnand %p181_p1, %p178_p0 }
   0x9   :  { %186 = shalt.err (!%p183_p2)
}
   0xa   :  { %s187_s23 = scalar_lea.vmem %s18_s13, 64  ;;  %p192_p4 = scmp.lt.s32.totalorder %s18_s13, %s18_s13 }
   0xb   :  { %p188_p3 = scmp.ne.s32.totalorder %s18_s13, %s187_s23  ;;  %p193_p5 = scmp.lt.s32.totalorder %s187_s23, %s187_s23 }
   0xd   :  { %p194_p6 = por %p193_p5, %p192_p4 }
   0xf   :  { %p195_p7 = pnand %p194_p6, %p188_p3 }
  0x11   :  { %198 = shalt.err (!%p195_p7)
}
  0x12   :  { %20 = dma.hbm_to_vmem [thread:$0]  %s322_s0, 64, %s18_s13, [#allocation3]  }
  0x13   :  { %s199_s28 = scalar_lea.hbm %s323_s1, 512 }
  0x14   :  { %p200_p8 = scmp.ne.s32.totalorder %s323_s1, %s199_s28  ;;  %p203_p9 = scmp.lt.u32.totalorder %s199_s28, %s323_s1 }
  0x16   :  { %p205_p10 = pnand %p203_p9, %p200_p8 }
  0x18   :  { %208 = shalt.err (!%p205_p10)
}
  0x19   :  { %s209_s6 = scalar_lea.vmem %s276_s15, 512  ;;  %p214_p12 = scmp.lt.s32.totalorder %s276_s15, %s276_s15 }
  0x1a   :  { %p210_p11 = scmp.ne.s32.totalorder %s276_s15, %s209_s6  ;;  %p215_p13 = scmp.lt.s32.totalorder %s209_s6, %s209_s6 }
  0x1c   :  { %p216_p0 = por %p215_p13, %p214_p12 }
  0x1e   :  { %p217_p1 = pnand %p216_p0, %p210_p11 }
  0x20   :  { %220 = shalt.err (!%p217_p1)
}
  0x21   :  { %s251_s0 = smov 64   ;;  %s252_s7 = smov 4  }
  0x22   :  { %32 = dma.hbm_to_vmem [thread:$0]  %s323_s1, 512, %s276_s15, [#allocation6], %s251_s0, %s251_s0, %s252_s7  }
  0x23   :  { %243 = dma.done.wait [#allocation3], 64  }
  0x24   :  { %244 = vsyncadd [#allocation3], 4294967232 }
  0x25   :  { %245 = dma.done.wait [#allocation6], 512  }
  0x26   :  { %246 = vsyncadd [#allocation6], 4294966784  ;;  %v253_v0 = vmov 0.0   ;;  %vm254_vm0 = vmmov 0   ;;  %v173_v1 = vld [vmem:[#allocation5] sm:$0xff]   ;;  %v174_v2 = vld [vmem:[#allocation5 + $0x8] sm:$0xff]  }
  0x27   :  { %154 = vmatprep.subr.bf16.mxu0 %v253_v0  ;;  %162 = vmatprep.mubr.msk.bf16.mxu0 %vm254_vm0, %v253_v0  ;;  %v175_v3 = vld [vmem:[#allocation5 + $0x10] sm:$0xff]   ;;  %v176_v4 = vld [vmem:[#allocation5 + $0x18] sm:$0xff]   ;;  %vm82_vm1 = vcmask 523264   ;;  %s255_s11 = smov [#allocation7]  }
  0x28   :  { %155 = vmatpush3.bf16.msra.mxu0 %v173_v1  ;;  %v42_v5 = vld [vmem:[#allocation2] sm:$0xf]  ;;  %s133_s12 = sshll.u32 %s255_s11, 4  ;;  %s134_s12 = int_to_ptr.vmem [resolvable:$true] %s133_s12 }
  0x29   :  { %156 = vmatprep.subr.bf16.mxu0 %v253_v0  ;;  %v143_v6 = vld [vmem:[%s324_s2] ss:$0 sm:$0xff]  ;;  %s221_s13 = scalar_lea.vmem %s134_s12, 128  ;;  %p226_p3 = scmp.lt.s32.totalorder %s134_s12, %s134_s12 }
  0x2a   :  { %p222_p2 = scmp.ne.s32.totalorder %s134_s12, %s221_s13  ;;  %p227_p4 = scmp.lt.s32.totalorder %s221_s13, %s221_s13 }
  0x2c   :  { %157 = vmatpush3.bf16.msra.mxu0 %v174_v2  ;;  %p228_p5 = por %p227_p4, %p226_p3 }
  0x2d   :  { %158 = vmatprep.subr.bf16.mxu0 %v253_v0 }
  0x2e   :  { %p229_p6 = pnand %p228_p5, %p222_p2 }
  0x30   :  { %159 = vmatpush3.bf16.msra.mxu0 %v175_v3 }
  0x31   :  { %160 = vmatprep.subr.bf16.mxu0 %v253_v0 }
  0x34   :  { %161 = vmatpush3.bf16.msra.mxu0 %v176_v4 }
  0x37   :  { %163 = vmatmul.mubr.msk.bf16.vlgmr.msra.gmra.mrb[0].mxu0 %vm82_vm1, %v42_v5 }
 0x10a   :  { %v120_v7 = vpop.f32.mrb[0].mxu0 }
 0x10b   :  { %v121_v8 = vadd.f32 %v143_v6, %v120_v7  ;;  %v164_v9 = vpop.f32.mrb[1].mxu0 }
 0x10c   :  { %v123_v10 = vpop.f32.mrb[2].mxu0 }
 0x10d   :  { %126 = vst [vmem:[#allocation7] sm:$0xff] %v121_v8  ;;  %v165_v11 = vpop.f32.mrb[3].mxu0 }
 0x10e   :  { %232 = shalt.err (!%p229_p6)
}
 0x10f   :  { %s233_s2 = scalar_lea.hbm %s325_s3, 128 }
 0x110   :  { %p234_p7 = scmp.ne.s32.totalorder %s325_s3, %s233_s2  ;;  %p237_p8 = scmp.lt.u32.totalorder %s233_s2, %s325_s3 }
 0x112   :  { %p239_p9 = pnand %p237_p8, %p234_p7 }
 0x114   :  { %242 = shalt.err (!%p239_p9)
}
 0x115   :  { %136 = dma.vmem_to_hbm [thread:$0]  %s134_s12, 128, %s325_s3, [#allocation4]  }
 0x116   :  { %247 = dma.done.wait [#allocation4], 128  }
 0x117   :  { %248 = vsyncadd [#allocation4], 4294967168 }
 0x118   :  { %140 = vsyncpa [#allocation3], 1 }
 0x119   :  { %141 = vsyncpa [#allocation6], 1 }
 0x11a   :  { %142 = vsyncpa [#allocation4], 1 }

</bundles_post_ra>
